<compile_context>
chip_gen: v7x
topology: tpu7x:2x2x1
jax: 0.10.0
libtpu: 0.0.40
codegen_flags: <defaults>
</compile_context>

<pallas_src>
import functools

import jax
import jax.numpy as jnp
from jax.experimental import pallas as pl
from jax.experimental.pallas import tpu as pltpu

LANES = 128


def _align8(n):
    return ((n + 7) // 8) * 8


# ---------------------------------------------------------------------------
# Kernel
# ---------------------------------------------------------------------------
def _duelnet_kernel(x_ref, p_ref, q_ref, *, d_in, hidden, n_actions, offs):
    """x_ref: (TB, d_in) f32; p_ref: packed param slab (rows, 128) f32;
    q_ref: (TB, n_actions) f32."""
    r_b, r_w0, r_w1, r_wav1, r_wq = offs
    H = hidden

    x = x_ref[...]                                         # (TB, d_in)

    # --- biases (one row each inside the first 8-row block of the slab) ---
    b0 = p_ref[r_b + 0:r_b + 1, 0:H]                       # (1, H)
    b1 = p_ref[r_b + 1:r_b + 2, 0:H]                       # (1, H)
    bAV1 = p_ref[r_b + 2:r_b + 3, 0:2 * H]                 # (1, 2H)
    bQ = p_ref[r_b + 3:r_b + 4, 0:n_actions]               # (1, nA)

    # --- weights (static, sublane-aligned slices of the slab) ---
    w0 = p_ref[r_w0:r_w0 + d_in, 0:H]                      # (d_in, H)
    w1 = p_ref[r_w1:r_w1 + H, 0:H]                         # (H, H)
    wAV1 = p_ref[r_wav1:r_wav1 + H, 0:2 * H]               # (H, 2H)  fused A|V stage-1
    wQ = p_ref[r_wq:r_wq + 2 * H, 0:n_actions]             # (2H, nA) fused Q stage-2

    # --- MLP trunk: relu between layers, none after the last trunk layer ---
    h = jnp.maximum(jnp.dot(x, w0, preferred_element_type=jnp.float32) + b0, 0.0)
    h = jnp.dot(h, w1, preferred_element_type=jnp.float32) + b1

    # --- dueling head (fused) ---
    h = jnp.maximum(h, 0.0)
    hav = jnp.maximum(
        jnp.dot(h, wAV1, preferred_element_type=jnp.float32) + bAV1, 0.0
    )                                                      # [hA | hV], (TB, 2H)
    # Dueling combine is pre-folded into wQ / bQ, so this matmul IS Q.
    q_ref[...] = jnp.dot(hav, wQ, preferred_element_type=jnp.float32) + bQ


# ---------------------------------------------------------------------------
# Parameter packing (algebraic fusion done once, outside the kernel)
# ---------------------------------------------------------------------------
def pack_duelnet_params(params):
    """params: [(w0,b0),(w1,b1),(wA1,bA1),(wA2,bA2),(wV1,bV1),(wV2,bV2)],
    weights already (in, out), biases (1, out). Returns (slab, meta)."""
    (w0, b0), (w1, b1), (wA1, bA1), (wA2, bA2), (wV1, bV1), (wV2, bV2) = params
    d_in, H = w0.shape
    n_actions = wA2.shape[1]
    assert 2 * H <= LANES and d_in <= LANES and n_actions <= LANES

    # (1) fuse fcA1 / fcV1 into a single (H, 2H) layer
    wAV1 = jnp.concatenate([wA1, wV1], axis=1)             # (H, 2H)
    bAV1 = jnp.concatenate([bA1, bV1], axis=1)             # (1, 2H)

    # (2) fold Q = V - A.mean + A into the second-stage weights
    wA2c = wA2 - jnp.mean(wA2, axis=1, keepdims=True)      # (H, nA)
    bA2c = bA2 - jnp.mean(bA2)                             # (1, nA)
    wQ = jnp.concatenate([wA2c, jnp.tile(wV2, (1, n_actions))], axis=0)  # (2H, nA)
    bQ = bA2c + bV2                                        # (1, nA)

    # (3) pack everything into one sublane-aligned, 128-lane-wide f32 slab
    r_b = 0
    r_w0 = 8
    r_w1 = r_w0 + _align8(d_in)
    r_wav1 = r_w1 + _align8(H)
    r_wq = r_wav1 + _align8(H)
    rows = r_wq + _align8(2 * H)

    slab = jnp.zeros((rows, LANES), jnp.float32)
    slab = slab.at[r_b + 0, 0:H].set(b0[0])
    slab = slab.at[r_b + 1, 0:H].set(b1[0])
    slab = slab.at[r_b + 2, 0:2 * H].set(bAV1[0])
    slab = slab.at[r_b + 3, 0:n_actions].set(bQ[0])
    slab = slab.at[r_w0:r_w0 + d_in, 0:H].set(w0)
    slab = slab.at[r_w1:r_w1 + H, 0:H].set(w1)
    slab = slab.at[r_wav1:r_wav1 + H, 0:2 * H].set(wAV1)
    slab = slab.at[r_wq:r_wq + 2 * H, 0:n_actions].set(wQ)

    meta = dict(d_in=int(d_in), hidden=int(H), n_actions=int(n_actions),
                offs=(r_b, r_w0, r_w1, r_wav1, r_wq))
    return slab, meta


# ---------------------------------------------------------------------------
# Wrapper
# ---------------------------------------------------------------------------
def duelnet_forward(x, slab, meta, *, tb=512):
    """x: (B, d_in) f32. Returns Q: (B, n_actions) f32."""
    B, d_in = x.shape
    n_actions = meta["n_actions"]

    if B <= tb:
        tb_eff = B                      # one full-extent block, any B allowed
        b_pad = B
    else:
        tb_eff = max(8, (tb // 8) * 8)  # (8,128)-aligned batch tile
        b_pad = pl.cdiv(B, tb_eff) * tb_eff

    x_p = x if b_pad == B else jnp.pad(x, ((0, b_pad - B), (0, 0)))

    kernel = functools.partial(_duelnet_kernel, **meta)

    q = pl.pallas_call(
        kernel,
        out_shape=jax.ShapeDtypeStruct((b_pad, n_actions), jnp.float32),
        grid=(b_pad // tb_eff,),
        in_specs=[
            pl.BlockSpec((tb_eff, d_in), lambda i: (i, 0)),     # batch-tiled x
            pl.BlockSpec(slab.shape, lambda i: (0, 0)),         # replicated params
        ],
        out_specs=pl.BlockSpec((tb_eff, n_actions), lambda i: (i, 0)),
        compiler_params=pltpu.CompilerParams(
            dimension_semantics=("parallel",),                  # megacore on v7x
        ),
    )(x_p, slab)
    return q[:B]


# ---------------------------------------------------------------------------
# Init + pure-JAX reference (mirrors the PyTorch forward)
# ---------------------------------------------------------------------------
def init_params(key, lsize):
    """Deterministic synthetic init. Returns [(W_t, b_row), ...]:
    trunk layers, then fcA1, fcA2, fcV1, fcV2."""
    lsize = list(lsize)
    out_size = lsize[-1]
    trunk_sizes = lsize[:-1]
    H = trunk_sizes[-1]

    def linear_init(key, fan_in, fan_out):
        kw, kb = jax.random.split(key)
        bound = 1.0 / (fan_in ** 0.5)
        w_t = jax.random.uniform(kw, (fan_in, fan_out), jnp.float32, -bound, bound)
        b = jax.random.uniform(kb, (1, fan_out), jnp.float32, -bound, bound)
        return w_t, b

    shapes = []
    for i in range(len(trunk_sizes) - 1):
        shapes.append((trunk_sizes[i], trunk_sizes[i + 1]))
    shapes += [(H, H), (H, out_size), (H, H), (H, 1)]   # fcA1, fcA2, fcV1, fcV2

    keys = jax.random.split(key, len(shapes))
    return [linear_init(k, fi, fo) for k, (fi, fo) in zip(keys, shapes)]


def duelnet_reference(x, params):
    (w0, b0), (w1, b1), (wA1, bA1), (wA2, bA2), (wV1, bV1), (wV2, bV2) = params
    h = jnp.maximum(x @ w0 + b0, 0.0)
    h = h @ w1 + b1
    h = jnp.maximum(h, 0.0)
    hA = jnp.maximum(h @ wA1 + bA1, 0.0)
    A = hA @ wA2 + bA2
    hV = jnp.maximum(h @ wV1 + bV1, 0.0)
    V = hV @ wV2 + bV2
    return V - A.mean(axis=1, keepdims=True) + A


if __name__ == "__main__":
    key = jax.random.PRNGKey(0)
    k_x, k_p = jax.random.split(key)

    lsize = [4, 32, 32, 2]   # cartpole: state_dim=4, hidden=32, n_actions=2
    batch = 256              # small, but enough to exercise the batch grid

    x = jax.random.normal(k_x, (batch, lsize[0]), jnp.float32)
    params = init_params(k_p, lsize)
    slab, meta = pack_duelnet_params(params)

    q = duelnet_forward(x, slab, meta, tb=128)   # grid=(2,)
    q = jax.block_until_ready(q)

    q_ref = duelnet_reference(x, params)
    assert q.shape == (batch, lsize[-1])
    assert jnp.allclose(q, q_ref, atol=1e-5, rtol=1e-5), "mismatch vs reference"

    print("KERNEL_OK")
</pallas_src>

<mosaic_0001>
module attributes {stable_mosaic.version = 11 : i64} {
  func.func @_duelnet_kernel(%arg0: i32, %arg1: memref<128x4xf32, #tpu.memory_space<vmem>>, %arg2: memref<144x128xf32, #tpu.memory_space<vmem>>, %arg3: memref<128x2xf32, #tpu.memory_space<vmem>>) attributes {dimension_semantics = [#tpu.dimension_semantics<parallel>], iteration_bounds = array<i64: 2>, scalar_prefetch = 0 : i64, scratch_operands = 0 : i64, tpu.core_type = #tpu.core_type<tc>, window_params = [{transform_indices = @transform_0, window_bounds = array<i64: 128, 4>}, {pipeline_mode = #tpu.pipeline_mode<synchronous>, transform_indices = @transform_1, window_bounds = array<i64: 144, 128>}, {transform_indices = @transform_2, window_bounds = array<i64: 128, 2>}]} {
    %c0 = arith.constant 0 : index
    %c0_0 = arith.constant 0 : index
    %0 = vector.load %arg1[%c0, %c0_0] : memref<128x4xf32, #tpu.memory_space<vmem>>, vector<128x4xf32>
    %c0_1 = arith.constant 0 : index
    %c0_2 = arith.constant 0 : index
    %1 = vector.load %arg2[%c0_1, %c0_2] : memref<144x128xf32, #tpu.memory_space<vmem>>, vector<1x32xf32>
    %c1 = arith.constant 1 : index
    %c0_3 = arith.constant 0 : index
    %2 = vector.load %arg2[%c1, %c0_3] : memref<144x128xf32, #tpu.memory_space<vmem>>, vector<1x32xf32>
    %c2 = arith.constant 2 : index
    %c0_4 = arith.constant 0 : index
    %3 = vector.load %arg2[%c2, %c0_4] : memref<144x128xf32, #tpu.memory_space<vmem>>, vector<1x64xf32>
    %c3 = arith.constant 3 : index
    %c0_5 = arith.constant 0 : index
    %4 = vector.load %arg2[%c3, %c0_5] : memref<144x128xf32, #tpu.memory_space<vmem>>, vector<1x2xf32>
    %c8 = arith.constant 8 : index
    %c0_6 = arith.constant 0 : index
    %5 = vector.load %arg2[%c8, %c0_6] : memref<144x128xf32, #tpu.memory_space<vmem>>, vector<4x32xf32>
    %c16 = arith.constant 16 : index
    %c0_7 = arith.constant 0 : index
    %6 = vector.load %arg2[%c16, %c0_7] : memref<144x128xf32, #tpu.memory_space<vmem>>, vector<32x32xf32>
    %c48 = arith.constant 48 : index
    %c0_8 = arith.constant 0 : index
    %7 = vector.load %arg2[%c48, %c0_8] : memref<144x128xf32, #tpu.memory_space<vmem>>, vector<32x64xf32>
    %c80 = arith.constant 80 : index
    %c0_9 = arith.constant 0 : index
    %8 = vector.load %arg2[%c80, %c0_9] : memref<144x128xf32, #tpu.memory_space<vmem>>, vector<64x2xf32>
    %cst = arith.constant dense<0.000000e+00> : vector<128x32xf32>
    %9 = tpu.matmul %0, %5, %cst {dimension_numbers = #tpu.dot_dimension_numbers<[1], [0], [0], [1], [0, 0, 1, 1], [], []>} : vector<128x4xf32>, vector<4x32xf32>, vector<128x32xf32> -> vector<128x32xf32>
    %10 = vector.broadcast %1 : vector<1x32xf32> to vector<128x32xf32>
    %11 = arith.addf %9, %10 : vector<128x32xf32>
    %cst_10 = arith.constant 0.000000e+00 : f32
    %12 = vector.broadcast %cst_10 : f32 to vector<128x32xf32>
    %13 = arith.maximumf %11, %12 : vector<128x32xf32>
    %cst_11 = arith.constant dense<0.000000e+00> : vector<128x32xf32>
    %14 = tpu.matmul %13, %6, %cst_11 {dimension_numbers = #tpu.dot_dimension_numbers<[1], [0], [0], [1], [0, 0, 1, 1], [], []>} : vector<128x32xf32>, vector<32x32xf32>, vector<128x32xf32> -> vector<128x32xf32>
    %15 = vector.broadcast %2 : vector<1x32xf32> to vector<128x32xf32>
    %16 = arith.addf %14, %15 : vector<128x32xf32>
    %cst_12 = arith.constant 0.000000e+00 : f32
    %17 = vector.broadcast %cst_12 : f32 to vector<128x32xf32>
    %18 = arith.maximumf %16, %17 : vector<128x32xf32>
    %cst_13 = arith.constant dense<0.000000e+00> : vector<128x64xf32>
    %19 = tpu.matmul %18, %7, %cst_13 {dimension_numbers = #tpu.dot_dimension_numbers<[1], [0], [0], [1], [0, 0, 1, 1], [], []>} : vector<128x32xf32>, vector<32x64xf32>, vector<128x64xf32> -> vector<128x64xf32>
    %20 = vector.broadcast %3 : vector<1x64xf32> to vector<128x64xf32>
    %21 = arith.addf %19, %20 : vector<128x64xf32>
    %cst_14 = arith.constant 0.000000e+00 : f32
    %22 = vector.broadcast %cst_14 : f32 to vector<128x64xf32>
    %23 = arith.maximumf %21, %22 : vector<128x64xf32>
    %cst_15 = arith.constant dense<0.000000e+00> : vector<128x2xf32>
    %24 = tpu.matmul %23, %8, %cst_15 {dimension_numbers = #tpu.dot_dimension_numbers<[1], [0], [0], [1], [0, 0, 1, 1], [], []>} : vector<128x64xf32>, vector<64x2xf32>, vector<128x2xf32> -> vector<128x2xf32>
    %25 = vector.broadcast %4 : vector<1x2xf32> to vector<128x2xf32>
    %26 = arith.addf %24, %25 : vector<128x2xf32>
    %c0_16 = arith.constant 0 : index
    %c0_17 = arith.constant 0 : index
    %27 = vector.load %arg3[%c0_16, %c0_17] : memref<128x2xf32, #tpu.memory_space<vmem>>, vector<128x2xf32>
    tpu.vector_store %arg3[%c0_16, %c0_17], %26 {strides = array<i32>} : memref<128x2xf32, #tpu.memory_space<vmem>>, vector<128x2xf32>,
    return
  }
  func.func @transform_0(%arg0: i32) -> (i32, i32) {
    %c0_i32 = arith.constant 0 : i32
    %c0_i32_0 = arith.constant 0 : i32
    return %arg0, %c0_i32 : i32, i32
  }
  func.func @transform_1(%arg0: i32) -> (i32, i32) {
    %c0_i32 = arith.constant 0 : i32
    %c0_i32_0 = arith.constant 0 : i32
    %c0_i32_1 = arith.constant 0 : i32
    return %c0_i32, %c0_i32_0 : i32, i32
  }
  func.func @transform_2(%arg0: i32) -> (i32, i32) {
    %c0_i32 = arith.constant 0 : i32
    %c0_i32_0 = arith.constant 0 : i32
    return %arg0, %c0_i32 : i32, i32
  }
}

</mosaic_0001>

<bundles_post_ra>
// kernel: tpu_custom_call.1
= control target key start
LH: loop header
LB: loop body
LE: loop exit
PB: predicated region body
PF: predicated region fallthrough
CT: control target
= control target key end

     0   :  { %s1454_s9 = smov 0   ;;  %s1657_s0 = inlined_call_operand.vmem [shape: f32[256,4], index: 0, kind: input, shape index: {}]   ;;  %s1658_s1 = inlined_call_operand.vmem [shape: f32[144,128], index: 1, kind: input, shape index: {}]   ;;  %s1659_s2 = inlined_call_operand.vmem [shape: f32[256,2], index: 2, kind: output, shape index: {}]  }
   0x1 LB: > { %s1100_s10 = sadd.s32 4294967295, %s1437_s9   ;;  %p1104_p0 = scmp.ge.s32.totalorder %s1437_s9, 1  ;;  %s1437_s9 = sphi %s1454_s9, %s12_s9  }
   0x2   : > { %p113_p1 = scmp.lt.s32.totalorder %s1437_s9, 3 }
   0x4   : > { %p114_p2 = pnand %p1104_p0, %p113_p1 }
   0x5   : > { %v167_v0 = vld [vmem:[%s1658_s1 + $0x8] sm:$0xf] (!%p114_p2)  ;;  %vm237_vm0 = vcmask (!%p114_p2), 1043456   ;;  %s1105_s13 = sshll.u32 (!%p114_p2), %s1100_s10, 4  ;;  %v168_v1 = vld [vmem:[%s1658_s1 + $0x10] sm:$0xff] (!%p114_p2)  ;;  %v169_v2 = vld [vmem:[%s1658_s1 + $0x18] sm:$0xff] (!%p114_p2) }
   0x6   : > { %117 = sbr.rel (%p114_p2) target bundleno = 916 (0x394), region = 28  ;;  %1261 = vmatprep.subr.msk.mxu0 (!%p114_p2), %vm237_vm0, %v167_v0  ;;  %p136_p3 = scmp.lt.s32.totalorder (!%p114_p2), %s1105_s13, 31  ;;  %v1391_v3 = vpack.c.bf16 (!%p114_p2), %v169_v2, %v168_v1  ;;  %vm188_vm1 = vcmask (!%p114_p2), 31744   ;;  %v170_v20 = vld [vmem:[%s1658_s1 + $0x20] sm:$0xff] (!%p114_p2)  ;;  %v171_v21 = vld [vmem:[%s1658_s1 + $0x28] sm:$0xff] (!%p114_p2)  ;;  %v172_v23 = vld [vmem:[%s1658_s1 + $0x30] sm:$0xff] (!%p114_p2) }
   0x7   : > { %1262 = vmatpush3.msk.msra.mxu0 (!%p114_p2), %vm237_vm0, %v167_v0  ;;  %v1395_v22 = vpack.c.bf16 (!%p114_p2), %v171_v21, %v170_v20  ;;  %v173_v24 = vld [vmem:[%s1658_s1 + $0x38] sm:$0xff] (!%p114_p2)  ;;  %v174_v25 = vld [vmem:[%s1658_s1 + $0x40] sm:$0xff] (!%p114_p2)  ;;  %v175_v27 = vld [vmem:[%s1658_s1 + $0x48] sm:$0xff] (!%p114_p2)  ;;  %vm406_vm2 = vcmask (!%p114_p2), 261120   ;;  %vm833_vm3 = vcmask (!%p114_p2), 523264   ;;  %vm1027_vm4 = vcmask (!%p114_p2), 15360  }
   0x8   : > { %1392 = vmatprep.subr.bf16.mxu1 (!%p114_p2), %v1391_v3  ;;  %v1399_v26 = vpack.c.bf16 (!%p114_p2), %v173_v24, %v172_v23  ;;  %v1403_v28 = vpack.c.bf16 (!%p114_p2), %v175_v27, %v174_v25  ;;  %v1109_v29 = vld [vmem:[%s1658_s1] ss:$0 sm:$0xff] (!%p114_p2)  ;;  %v180_v20 = vld [vmem:[%s1658_s1 + $0x70] sm:$0xff] (!%p114_p2)  ;;  %v181_v21 = vld [vmem:[%s1658_s1 + $0x78] sm:$0xff] (!%p114_p2) }
   0x9   : > { %1394 = vmatpush3.bf16.msra.mxu1 (!%p114_p2), %v1391_v3  ;;  %v182_v23 = vld [vmem:[%s1658_s1 + $0x80] sm:$0xff] (!%p114_p2)  ;;  %v183_v24 = vld [vmem:[%s1658_s1 + $0x88] sm:$0xff] (!%p114_p2) }
   0xa   : > { %1396 = vmatprep.subr.bf16.mxu1 (!%p114_p2), %v1395_v22  ;;  %1400 = vmatprep.subr.bf16.mxu0 (!%p114_p2), %v1399_v26  ;;  %v1419_v25 = vpack.c.bf16 (!%p114_p2), %v183_v24, %v182_v23 }
   0xd   : > { %s1661_s13 = smov (!%p136_p3, %s1105_s13), 31  ;;  %1398 = vmatpush3.bf16.msra.mxu1 %v1395_v22  ;;  %v1415_v22 = vpack.c.bf16 %v181_v21, %v180_v20 }
   0xe   : > { %s1106_s18 = sshll.u32 %s1661_s13, 3 }
   0xf   : > { %s1479_s21 = scalar_lea.vmem %s1657_s0, %s1106_s18  ;;  %s1620_s7 = scalar_lea.vmem %s1659_s2, %s1106_s18 }
  0x10   : > { %v147_v4 = vld [vmem:[%s1479_s21] sm:$0xff]  ;;  %v148_v5 = vld [vmem:[%s1479_s21 + $0x8] sm:$0xff]  ;;  %v149_v6 = vld [vmem:[%s1479_s21 + $0x10] sm:$0xff] }
  0x11   : > { %1263 = vmatprep.mubr.msk.f32.mxu0 %vm188_vm1, %v147_v4  ;;  %v150_v7 = vld [vmem:[%s1479_s21 + $0x18] sm:$0xff]  ;;  %v151_v8 = vld [vmem:[%s1479_s21 + $0x20] sm:$0xff]  ;;  %v152_v9 = vld [vmem:[%s1479_s21 + $0x28] sm:$0xff] }
  0x12   : > { %1264 = vmatmul.mubr.msk.f32.vlgmr.msra.gmra.mrb[0].mxu0 %vm188_vm1, %v148_v5  ;;  %v153_v10 = vld [vmem:[%s1479_s21 + $0x30] sm:$0xff]  ;;  %v154_v11 = vld [vmem:[%s1479_s21 + $0x38] sm:$0xff]  ;;  %v155_v12 = vld [vmem:[%s1479_s21 + $0x40] sm:$0xff] }
  0x13   : > { %1266 = vmatprep.mubr.msk.f32.mxu0 %vm188_vm1, %v149_v6  ;;  %v156_v13 = vld [vmem:[%s1479_s21 + $0x48] sm:$0xff]  ;;  %v157_v14 = vld [vmem:[%s1479_s21 + $0x50] sm:$0xff]  ;;  %v158_v15 = vld [vmem:[%s1479_s21 + $0x58] sm:$0xff]  ;;  %1402 = vmatpush3.bf16.msra.mxu0 %v1399_v26 }
  0x14   : > { %v159_v16 = vld [vmem:[%s1479_s21 + $0x60] sm:$0xff]  ;;  %v160_v17 = vld [vmem:[%s1479_s21 + $0x68] sm:$0xff]  ;;  %v161_v18 = vld [vmem:[%s1479_s21 + $0x70] sm:$0xff]  ;;  %1404 = vmatprep.subr.bf16.mxu0 %v1403_v28 }
  0x15   : > { %v162_v19 = vld [vmem:[%s1479_s21 + $0x78] sm:$0xff]  ;;  %v1127_v26 = vld [vmem:[%s1658_s1 + $0x1] ss:$0 sm:$0xff] }
  0x16   : > { %1267 = vmatmul.mubr.msk.f32.gmra.mrb[2].mxu0 %vm188_vm1, %v150_v7 }
  0x17   : > { %1269 = vmatprep.mubr.msk.f32.mxu0 %vm188_vm1, %v151_v8  ;;  %1406 = vmatpush3.bf16.msra.mxu0 %v1403_v28 }
  0x1a   : > { %1270 = vmatmul.mubr.msk.f32.gmra.mrb[4].mxu0 %vm188_vm1, %v152_v9 }
  0x1b   : > { %1272 = vmatprep.mubr.msk.f32.mxu0 %vm188_vm1, %v153_v10 }
  0x1e   : > { %1273 = vmatmul.mubr.msk.f32.gmra.mrb[6].mxu0 %vm188_vm1, %v154_v11 }
  0x1f   : > { %1275 = vmatprep.mubr.msk.f32.mxu0 %vm188_vm1, %v155_v12 }
  0x22   : > { %1276 = vmatmul.mubr.msk.f32.gmra.mrb[8].mxu0 %vm188_vm1, %v156_v13 }
  0x23   : > { %1278 = vmatprep.mubr.msk.f32.mxu0 %vm188_vm1, %v157_v14  ;;  %v176_v14 = vld [vmem:[%s1658_s1 + $0x50] sm:$0xff] }
  0x26   : > { %1279 = vmatmul.mubr.msk.f32.gmra.mrb[10].mxu0 %vm188_vm1, %v158_v15  ;;  %v177_v15 = vld [vmem:[%s1658_s1 + $0x58] sm:$0xff] }
  0x27   : > { %1281 = vmatprep.mubr.msk.f32.mxu0 %vm188_vm1, %v159_v16  ;;  %v178_v16 = vld [vmem:[%s1658_s1 + $0x60] sm:$0xff] }
  0x2a   : > { %1282 = vmatmul.mubr.msk.f32.gmra.mrb[12].mxu0 %vm188_vm1, %v160_v17  ;;  %v1407_v17 = vpack.c.bf16 %v177_v15, %v176_v14 }
  0x2b   : > { %1284 = vmatprep.mubr.msk.f32.mxu0 %vm188_vm1, %v161_v18  ;;  %v179_v18 = vld [vmem:[%s1658_s1 + $0x68] sm:$0xff] }
  0x2c   : > { %1408 = vmatprep.subr.bf16.mxu1 %v1407_v17 }
  0x2e   : > { %1285 = vmatmul.mubr.msk.f32.gmra.mrb[14].mxu0 %vm188_vm1, %v162_v19  ;;  %v1411_v19 = vpack.c.bf16 %v179_v18, %v178_v16 }
  0xe5   : > { %v1265_v30 = vpop.f32.mrb[0].mxu0 }
  0xe6   : > { %v313_v31 = vadd.f32 %v1265_v30, %v1109_v29  ;;  %v307_v32 = vpop.f32.mrb[1].mxu0 }
  0xe7   : > { %v308_v33 = vadd.f32 %v1109_v29, %v307_v32 }
  0xe8   : > { %v387_v36 = vmax.f32 %v313_v31, 0.0 }
  0xe9   : > { %v386_v34 = vmax.f32 %v308_v33, 0.0  ;;  %v1268_v35 = vpop.f32.mrb[2].mxu0 }
  0xea   : > { %v323_v37 = vadd.f32 %v1268_v35, %v1109_v29  ;;  %v317_v38 = vpop.f32.mrb[3].mxu0 }
  0xeb   : > { %v318_v39 = vadd.f32 %v1109_v29, %v317_v38  ;;  %1295 = vmatprep.mubr.msk.f32.mxu1 %vm406_vm2, %v386_v34 }
  0xec   : > { %1296 = vmatmul.mubr.msk.f32.vlgmr.msra.gmra.mrb[0].mxu1 %vm406_vm2, %v387_v36  ;;  %v389_v42 = vmax.f32 %v323_v37, 0.0 }
  0xed   : > { %v388_v40 = vmax.f32 %v318_v39, 0.0  ;;  %v1271_v41 = vpop.f32.mrb[4].mxu0  ;;  %1410 = vmatpush3.bf16.msra.mxu1 %v1407_v17 }
  0xee   : > { %v333_v43 = vadd.f32 %v1271_v41, %v1109_v29  ;;  %v327_v44 = vpop.f32.mrb[5].mxu0  ;;  %1412 = vmatprep.subr.bf16.mxu1 %v1411_v19 }
  0xef   : > { %v328_v45 = vadd.f32 %v1109_v29, %v327_v44  ;;  %1298 = vmatprep.mubr.msk.f32.mxu1 %vm406_vm2, %v388_v40 }
  0xf0   : > { %1299 = vmatmul.mubr.msk.f32.gmra.mrb[2].mxu1 %vm406_vm2, %v389_v42  ;;  %v391_v48 = vmax.f32 %v333_v43, 0.0 }
  0xf1   : > { %v390_v46 = vmax.f32 %v328_v45, 0.0  ;;  %v1274_v47 = vpop.f32.mrb[6].mxu0  ;;  %1414 = vmatpush3.bf16.msra.mxu1 %v1411_v19 }
  0xf2   : > { %v343_v49 = vadd.f32 %v1274_v47, %v1109_v29  ;;  %v337_v50 = vpop.f32.mrb[7].mxu0  ;;  %1416 = vmatprep.subr.bf16.mxu1 %v1415_v22 }
  0xf3   : > { %v338_v51 = vadd.f32 %v1109_v29, %v337_v50  ;;  %1301 = vmatprep.mubr.msk.f32.mxu1 %vm406_vm2, %v390_v46 }
  0xf4   : > { %1302 = vmatmul.mubr.msk.f32.gmra.mrb[4].mxu1 %vm406_vm2, %v391_v48  ;;  %v393_v54 = vmax.f32 %v343_v49, 0.0 }
  0xf5   : > { %v392_v52 = vmax.f32 %v338_v51, 0.0  ;;  %v1277_v53 = vpop.f32.mrb[8].mxu0  ;;  %1418 = vmatpush3.bf16.msra.mxu1 %v1415_v22 }
  0xf6   : > { %v353_v55 = vadd.f32 %v1277_v53, %v1109_v29  ;;  %v347_v56 = vpop.f32.mrb[9].mxu0  ;;  %1420 = vmatprep.subr.bf16.mxu1 %v1419_v25 }
  0xf7   : > { %v348_v57 = vadd.f32 %v1109_v29, %v347_v56  ;;  %1304 = vmatprep.mubr.msk.f32.mxu1 %vm406_vm2, %v392_v52 }
  0xf8   : > { %1305 = vmatmul.mubr.msk.f32.gmra.mrb[6].mxu1 %vm406_vm2, %v393_v54  ;;  %v395_v60 = vmax.f32 %v353_v55, 0.0 }
  0xf9   : > { %v394_v58 = vmax.f32 %v348_v57, 0.0  ;;  %v1280_v59 = vpop.f32.mrb[10].mxu0  ;;  %1422 = vmatpush3.bf16.msra.mxu1 %v1419_v25 }
  0xfa   : > { %v363_v61 = vadd.f32 %v1280_v59, %v1109_v29  ;;  %v357_v62 = vpop.f32.mrb[11].mxu0 }
  0xfb   : > { %v358_v63 = vadd.f32 %v1109_v29, %v357_v62  ;;  %1307 = vmatprep.mubr.msk.f32.mxu1 %vm406_vm2, %v394_v58 }
  0xfc   : > { %1308 = vmatmul.mubr.msk.f32.gmra.mrb[8].mxu1 %vm406_vm2, %v395_v60  ;;  %v397_v2 = vmax.f32 %v363_v61, 0.0 }
  0xfd   : > { %v396_v0 = vmax.f32 %v358_v63, 0.0  ;;  %v1283_v1 = vpop.f32.mrb[12].mxu0 }
  0xfe   : > { %v373_v3 = vadd.f32 %v1283_v1, %v1109_v29  ;;  %v367_v4 = vpop.f32.mrb[13].mxu0 }
  0xff   : > { %v368_v5 = vadd.f32 %v1109_v29, %v367_v4  ;;  %1310 = vmatprep.mubr.msk.f32.mxu1 %vm406_vm2, %v396_v0 }
 0x100   : > { %1311 = vmatmul.mubr.msk.f32.gmra.mrb[10].mxu1 %vm406_vm2, %v397_v2  ;;  %v399_v8 = vmax.f32 %v373_v3, 0.0 }
 0x101   : > { %v398_v6 = vmax.f32 %v368_v5, 0.0  ;;  %v1286_v7 = vpop.f32.mrb[14].mxu0 }
 0x102   : > { %v383_v9 = vadd.f32 %v1286_v7, %v1109_v29  ;;  %v377_v10 = vpop.f32.mrb[15].mxu0 }
 0x103   : > { %v378_v11 = vadd.f32 %v1109_v29, %v377_v10  ;;  %1313 = vmatprep.mubr.msk.f32.mxu1 %vm406_vm2, %v398_v6 }
 0x104   : > { %1314 = vmatmul.mubr.msk.f32.gmra.mrb[12].mxu1 %vm406_vm2, %v399_v8  ;;  %v401_v13 = vmax.f32 %v383_v9, 0.0 }
 0x105   : > { %v400_v12 = vmax.f32 %v378_v11, 0.0  ;;  %v1144_v11 = vld [vmem:[%s1658_s1 + $0x2] ss:$0 sm:$0xff] }
 0x107   : > { %1316 = vmatprep.mubr.msk.f32.mxu1 %vm406_vm2, %v400_v12 }
 0x108   : > { %1317 = vmatmul.mubr.msk.f32.gmra.mrb[14].mxu1 %vm406_vm2, %v401_v13 }
 0x1bf   : > { %v1297_v27 = vpop.f32.mrb[0].mxu1 }
 0x1c0   : > { %v527_v28 = vadd.f32 %v1297_v27, %v1127_v26  ;;  %v521_v29 = vpop.f32.mrb[1].mxu1 }
 0x1c1   : > { %v522_v30 = vadd.f32 %v1127_v26, %v521_v29 }
 0x1c2   : > { %v601_v33 = vmax.f32 %v527_v28, 0.0 }
 0x1c3   : > { %v600_v31 = vmax.f32 %v522_v30, 0.0  ;;  %v1300_v32 = vpop.f32.mrb[2].mxu1 }
 0x1c4   : > { %v537_v34 = vadd.f32 %v1300_v32, %v1127_v26  ;;  %v531_v35 = vpop.f32.mrb[3].mxu1 }
 0x1c5   : > { %v532_v36 = vadd.f32 %v1127_v26, %v531_v35  ;;  %1327 = vmatprep.mubr.msk.f32.mxu0 %vm406_vm2, %v600_v31 }
 0x1c6   : > { %1328 = vmatmul.mubr.msk.f32.vlgmr.msra.gmra.mrb[16].mxu0 %vm406_vm2, %v601_v33  ;;  %v603_v39 = vmax.f32 %v537_v34, 0.0 }
 0x1c7   : > { %v602_v37 = vmax.f32 %v532_v36, 0.0  ;;  %v1303_v38 = vpop.f32.mrb[4].mxu1 }
 0x1c8   : > { %v547_v40 = vadd.f32 %v1303_v38, %v1127_v26  ;;  %v541_v41 = vpop.f32.mrb[5].mxu1 }
 0x1c9   : > { %v542_v42 = vadd.f32 %v1127_v26, %v541_v41  ;;  %1330 = vmatprep.mubr.msk.f32.mxu0 %vm406_vm2, %v602_v37 }
 0x1ca   : > { %1331 = vmatmul.mubr.msk.f32.gmra.mrb[18].mxu0 %vm406_vm2, %v603_v39  ;;  %v605_v45 = vmax.f32 %v547_v40, 0.0 }
 0x1cb   : > { %v604_v43 = vmax.f32 %v542_v42, 0.0  ;;  %v1306_v44 = vpop.f32.mrb[6].mxu1 }
 0x1cc   : > { %v557_v46 = vadd.f32 %v1306_v44, %v1127_v26  ;;  %v551_v47 = vpop.f32.mrb[7].mxu1 }
 0x1cd   : > { %v552_v48 = vadd.f32 %v1127_v26, %v551_v47  ;;  %1333 = vmatprep.mubr.msk.f32.mxu0 %vm406_vm2, %v604_v43 }
 0x1ce   : > { %1334 = vmatmul.mubr.msk.f32.gmra.mrb[20].mxu0 %vm406_vm2, %v605_v45  ;;  %v607_v51 = vmax.f32 %v557_v46, 0.0 }
 0x1cf   : > { %v606_v49 = vmax.f32 %v552_v48, 0.0  ;;  %v1309_v50 = vpop.f32.mrb[8].mxu1 }
 0x1d0   : > { %v567_v52 = vadd.f32 %v1309_v50, %v1127_v26  ;;  %v561_v53 = vpop.f32.mrb[9].mxu1 }
 0x1d1   : > { %v562_v54 = vadd.f32 %v1127_v26, %v561_v53  ;;  %1336 = vmatprep.mubr.msk.f32.mxu0 %vm406_vm2, %v606_v49 }
 0x1d2   : > { %1337 = vmatmul.mubr.msk.f32.gmra.mrb[22].mxu0 %vm406_vm2, %v607_v51  ;;  %v609_v57 = vmax.f32 %v567_v52, 0.0 }
 0x1d3   : > { %v608_v55 = vmax.f32 %v562_v54, 0.0  ;;  %v1312_v56 = vpop.f32.mrb[10].mxu1 }
 0x1d4   : > { %v577_v58 = vadd.f32 %v1312_v56, %v1127_v26  ;;  %v571_v59 = vpop.f32.mrb[11].mxu1 }
 0x1d5   : > { %v572_v60 = vadd.f32 %v1127_v26, %v571_v59  ;;  %1339 = vmatprep.mubr.msk.f32.mxu0 %vm406_vm2, %v608_v55 }
 0x1d6   : > { %1340 = vmatmul.mubr.msk.f32.gmra.mrb[24].mxu0 %vm406_vm2, %v609_v57  ;;  %v611_v63 = vmax.f32 %v577_v58, 0.0 }
 0x1d7   : > { %v610_v61 = vmax.f32 %v572_v60, 0.0  ;;  %v1315_v62 = vpop.f32.mrb[12].mxu1  ;;  %v1161_v60 = vld [vmem:[%s1658_s1 + $0x3] ss:$0 sm:$0xff] }
 0x1d8   : > { %v587_v0 = vadd.f32 %v1315_v62, %v1127_v26  ;;  %v581_v1 = vpop.f32.mrb[13].mxu1 }
 0x1d9   : > { %v582_v2 = vadd.f32 %v1127_v26, %v581_v1  ;;  %1342 = vmatprep.mubr.msk.f32.mxu0 %vm406_vm2, %v610_v61 }
 0x1da   : > { %1343 = vmatmul.mubr.msk.f32.gmra.mrb[26].mxu0 %vm406_vm2, %v611_v63  ;;  %v613_v5 = vmax.f32 %v587_v0, 0.0 }
 0x1db   : > { %v612_v3 = vmax.f32 %v582_v2, 0.0  ;;  %v1318_v4 = vpop.f32.mrb[14].mxu1 }
 0x1dc   : > { %v597_v6 = vadd.f32 %v1318_v4, %v1127_v26  ;;  %v591_v7 = vpop.f32.mrb[15].mxu1 }
 0x1dd   : > { %v592_v8 = vadd.f32 %v1127_v26, %v591_v7  ;;  %1345 = vmatprep.mubr.msk.f32.mxu0 %vm406_vm2, %v612_v3 }
 0x1de   : > { %1346 = vmatmul.mubr.msk.f32.gmra.mrb[28].mxu0 %vm406_vm2, %v613_v5  ;;  %v615_v10 = vmax.f32 %v597_v6, 0.0 }
 0x1df   : > { %v614_v9 = vmax.f32 %v592_v8, 0.0 }
 0x1e1   : > { %1348 = vmatprep.mubr.msk.f32.mxu0 %vm406_vm2, %v614_v9 }
 0x1e2   : > { %1349 = vmatmul.mubr.msk.f32.gmra.mrb[30].mxu0 %vm406_vm2, %v615_v10 }
 0x299   : > { %v1329_v12 = vpop.f32.mrb[16].mxu0 }
 0x29a   : > { %v740_v13 = vadd.f32 %v1329_v12, %v1144_v11  ;;  %v734_v14 = vpop.f32.mrb[17].mxu0 }
 0x29b   : > { %v735_v15 = vadd.f32 %v1144_v11, %v734_v14 }
 0x29c   : > { %v814_v18 = vmax.f32 %v740_v13, 0.0 }
 0x29d   : > { %v813_v16 = vmax.f32 %v735_v15, 0.0  ;;  %v1332_v17 = vpop.f32.mrb[18].mxu0 }
 0x29e   : > { %v750_v19 = vadd.f32 %v1332_v17, %v1144_v11  ;;  %v744_v20 = vpop.f32.mrb[19].mxu0 }
 0x29f   : > { %v745_v21 = vadd.f32 %v1144_v11, %v744_v20  ;;  %1367 = vmatprep.mubr.msk.f32.mxu1 %vm833_vm3, %v813_v16 }
 0x2a0   : > { %1368 = vmatmul.mubr.msk.f32.vlgmr.msra.gmra.mrb[16].mxu1 %vm833_vm3, %v814_v18  ;;  %v816_v24 = vmax.f32 %v750_v19, 0.0 }
 0x2a1   : > { %v815_v22 = vmax.f32 %v745_v21, 0.0  ;;  %v1335_v23 = vpop.f32.mrb[20].mxu0 }
 0x2a2   : > { %v760_v25 = vadd.f32 %v1335_v23, %v1144_v11  ;;  %v754_v26 = vpop.f32.mrb[21].mxu0 }
 0x2a3   : > { %v755_v27 = vadd.f32 %v1144_v11, %v754_v26  ;;  %1370 = vmatprep.mubr.msk.f32.mxu1 %vm833_vm3, %v815_v22 }
 0x2a4   : > { %1371 = vmatmul.mubr.msk.f32.gmra.mrb[18].mxu1 %vm833_vm3, %v816_v24  ;;  %v818_v30 = vmax.f32 %v760_v25, 0.0 }
 0x2a5   : > { %v817_v28 = vmax.f32 %v755_v27, 0.0  ;;  %v1338_v29 = vpop.f32.mrb[22].mxu0 }
 0x2a6   : > { %v770_v31 = vadd.f32 %v1338_v29, %v1144_v11  ;;  %v764_v32 = vpop.f32.mrb[23].mxu0 }
 0x2a7   : > { %v765_v33 = vadd.f32 %v1144_v11, %v764_v32  ;;  %1373 = vmatprep.mubr.msk.f32.mxu1 %vm833_vm3, %v817_v28 }
 0x2a8   : > { %1374 = vmatmul.mubr.msk.f32.gmra.mrb[20].mxu1 %vm833_vm3, %v818_v30  ;;  %v820_v36 = vmax.f32 %v770_v31, 0.0 }
 0x2a9   : > { %v819_v34 = vmax.f32 %v765_v33, 0.0  ;;  %v1341_v35 = vpop.f32.mrb[24].mxu0 }
 0x2aa   : > { %v780_v37 = vadd.f32 %v1341_v35, %v1144_v11  ;;  %v774_v38 = vpop.f32.mrb[25].mxu0 }
 0x2ab   : > { %v775_v39 = vadd.f32 %v1144_v11, %v774_v38  ;;  %1376 = vmatprep.mubr.msk.f32.mxu1 %vm833_vm3, %v819_v34 }
 0x2ac   : > { %1377 = vmatmul.mubr.msk.f32.gmra.mrb[22].mxu1 %vm833_vm3, %v820_v36  ;;  %v822_v42 = vmax.f32 %v780_v37, 0.0 }
 0x2ad   : > { %v821_v40 = vmax.f32 %v775_v39, 0.0  ;;  %v1344_v41 = vpop.f32.mrb[26].mxu0 }
 0x2ae   : > { %v790_v43 = vadd.f32 %v1344_v41, %v1144_v11  ;;  %v784_v44 = vpop.f32.mrb[27].mxu0 }
 0x2af   : > { %v785_v45 = vadd.f32 %v1144_v11, %v784_v44  ;;  %1379 = vmatprep.mubr.msk.f32.mxu1 %vm833_vm3, %v821_v40 }
 0x2b0   : > { %1380 = vmatmul.mubr.msk.f32.gmra.mrb[24].mxu1 %vm833_vm3, %v822_v42  ;;  %v824_v48 = vmax.f32 %v790_v43, 0.0 }
 0x2b1   : > { %v823_v46 = vmax.f32 %v785_v45, 0.0  ;;  %v1347_v47 = vpop.f32.mrb[28].mxu0 }
 0x2b2   : > { %v800_v49 = vadd.f32 %v1347_v47, %v1144_v11  ;;  %v794_v50 = vpop.f32.mrb[29].mxu0 }
 0x2b3   : > { %v795_v51 = vadd.f32 %v1144_v11, %v794_v50  ;;  %1382 = vmatprep.mubr.msk.f32.mxu1 %vm833_vm3, %v823_v46 }
 0x2b4   : > { %1383 = vmatmul.mubr.msk.f32.gmra.mrb[26].mxu1 %vm833_vm3, %v824_v48  ;;  %v826_v54 = vmax.f32 %v800_v49, 0.0 }
 0x2b5   : > { %v825_v52 = vmax.f32 %v795_v51, 0.0  ;;  %v1350_v53 = vpop.f32.mrb[30].mxu0 }
 0x2b6   : > { %v810_v55 = vadd.f32 %v1350_v53, %v1144_v11  ;;  %v804_v56 = vpop.f32.mrb[31].mxu0 }
 0x2b7   : > { %v805_v57 = vadd.f32 %v1144_v11, %v804_v56  ;;  %1385 = vmatprep.mubr.msk.f32.mxu1 %vm833_vm3, %v825_v52 }
 0x2b8   : > { %1386 = vmatmul.mubr.msk.f32.gmra.mrb[28].mxu1 %vm833_vm3, %v826_v54  ;;  %v828_v59 = vmax.f32 %v810_v55, 0.0 }
 0x2b9   : > { %v827_v58 = vmax.f32 %v805_v57, 0.0 }
 0x2bb   : > { %1388 = vmatprep.mubr.msk.f32.mxu1 %vm833_vm3, %v827_v58 }
 0x2bc   : > { %1389 = vmatmul.mubr.msk.f32.gmra.mrb[30].mxu1 %vm833_vm3, %v828_v59 }
 0x373   : > { %v1369_v61 = vpop.f32.mrb[16].mxu1 }
 0x374   : > { %v954_v62 = vadd.f32 %v1369_v61, %v1161_v60  ;;  %v948_v63 = vpop.f32.mrb[17].mxu1 }
 0x375   : > { %v949_v0 = vadd.f32 %v1161_v60, %v948_v63 }
 0x376   : > { %1029 = vst.msk [vmem:[%s1620_s7 + $0x8] sm:$0xff] %vm1027_vm4, %v954_v62 }
 0x377   : > { %1028 = vst.msk [vmem:[%s1620_s7] sm:$0xff] %vm1027_vm4, %v949_v0  ;;  %v1372_v1 = vpop.f32.mrb[18].mxu1 }
 0x378   : > { %v964_v2 = vadd.f32 %v1372_v1, %v1161_v60  ;;  %v958_v3 = vpop.f32.mrb[19].mxu1 }
 0x379   : > { %v959_v4 = vadd.f32 %v1161_v60, %v958_v3 }
 0x37a   : > { %1031 = vst.msk [vmem:[%s1620_s7 + $0x18] sm:$0xff] %vm1027_vm4, %v964_v2 }
 0x37b   : > { %1030 = vst.msk [vmem:[%s1620_s7 + $0x10] sm:$0xff] %vm1027_vm4, %v959_v4  ;;  %v1375_v5 = vpop.f32.mrb[20].mxu1 }
 0x37c   : > { %v974_v6 = vadd.f32 %v1375_v5, %v1161_v60  ;;  %v968_v7 = vpop.f32.mrb[21].mxu1 }
 0x37d   : > { %v969_v8 = vadd.f32 %v1161_v60, %v968_v7 }
 0x37e   : > { %1033 = vst.msk [vmem:[%s1620_s7 + $0x28] sm:$0xff] %vm1027_vm4, %v974_v6 }
 0x37f   : > { %1032 = vst.msk [vmem:[%s1620_s7 + $0x20] sm:$0xff] %vm1027_vm4, %v969_v8  ;;  %v1378_v9 = vpop.f32.mrb[22].mxu1 }
 0x380   : > { %v984_v10 = vadd.f32 %v1378_v9, %v1161_v60  ;;  %v978_v11 = vpop.f32.mrb[23].mxu1 }
 0x381   : > { %v979_v12 = vadd.f32 %v1161_v60, %v978_v11 }
 0x382   : > { %1035 = vst.msk [vmem:[%s1620_s7 + $0x38] sm:$0xff] %vm1027_vm4, %v984_v10 }
 0x383   : > { %1034 = vst.msk [vmem:[%s1620_s7 + $0x30] sm:$0xff] %vm1027_vm4, %v979_v12  ;;  %v1381_v13 = vpop.f32.mrb[24].mxu1 }
 0x384   : > { %v994_v14 = vadd.f32 %v1381_v13, %v1161_v60  ;;  %v988_v15 = vpop.f32.mrb[25].mxu1 }
 0x385   : > { %v989_v16 = vadd.f32 %v1161_v60, %v988_v15 }
 0x386   : > { %1037 = vst.msk [vmem:[%s1620_s7 + $0x48] sm:$0xff] %vm1027_vm4, %v994_v14 }
 0x387   : > { %1036 = vst.msk [vmem:[%s1620_s7 + $0x40] sm:$0xff] %vm1027_vm4, %v989_v16  ;;  %v1384_v17 = vpop.f32.mrb[26].mxu1 }
 0x388   : > { %v1004_v18 = vadd.f32 %v1384_v17, %v1161_v60  ;;  %v998_v19 = vpop.f32.mrb[27].mxu1 }
 0x389   : > { %v999_v20 = vadd.f32 %v1161_v60, %v998_v19 }
 0x38a   : > { %1039 = vst.msk [vmem:[%s1620_s7 + $0x58] sm:$0xff] %vm1027_vm4, %v1004_v18 }
 0x38b   : > { %1038 = vst.msk [vmem:[%s1620_s7 + $0x50] sm:$0xff] %vm1027_vm4, %v999_v20  ;;  %v1387_v21 = vpop.f32.mrb[28].mxu1 }
 0x38c   : > { %v1014_v22 = vadd.f32 %v1387_v21, %v1161_v60  ;;  %v1008_v23 = vpop.f32.mrb[29].mxu1 }
 0x38d   : > { %v1009_v24 = vadd.f32 %v1161_v60, %v1008_v23 }
 0x38e   : > { %1041 = vst.msk [vmem:[%s1620_s7 + $0x68] sm:$0xff] %vm1027_vm4, %v1014_v22 }
 0x38f   : > { %1040 = vst.msk [vmem:[%s1620_s7 + $0x60] sm:$0xff] %vm1027_vm4, %v1009_v24  ;;  %v1390_v25 = vpop.f32.mrb[30].mxu1 }
 0x390   : > { %v1024_v26 = vadd.f32 %v1390_v25, %v1161_v60  ;;  %v1018_v27 = vpop.f32.mrb[31].mxu1 }
 0x391   : > { %v1019_v28 = vadd.f32 %v1161_v60, %v1018_v27 }
 0x392   : > { %1043 = vst.msk [vmem:[%s1620_s7 + $0x78] sm:$0xff] %vm1027_vm4, %v1024_v26 }
 0x393   : > { %1042 = vst.msk [vmem:[%s1620_s7 + $0x70] sm:$0xff] %vm1027_vm4, %v1019_v28 }
 0x394 PF: > { %s12_s9 = sadd.s32 1, %s1437_s9  }
 0x395   : > { %p9_p4 = scmp.ge.s32.totalorder %s12_s9, 4  }
 0x397   :  { %11 = sbr.rel (!%p9_p4) target bundleno = 1 (0x1), region = 58 }

</bundles_post_ra>
